<compile_context>
chip_gen: v6e
topology: v6e:2x2x1
jax: 0.10.0
libtpu: 0.0.40
codegen_flags: <defaults>
</compile_context>

<pallas_src>
import jax
import jax.numpy as jnp
from jax.experimental import pallas as pl
from jax.experimental.pallas import tpu as pltpu


def _round_up(x: int, m: int) -> int:
    return ((x + m - 1) // m) * m


def _score_split_kernel(h_ref, t_ref, nt_ref, nh_ref, pos_ref, neg_ref):
    """Blocks: h/t (TB, D); nt (TB, K1, D); nh (TB, K2, D).
    Outputs: pos (TB, 1); neg (TB, K1+K2)."""
    h_e = h_ref[...].astype(jnp.float32)          # (TB, D)
    t_e = t_ref[...].astype(jnp.float32)          # (TB, D)
    nt = nt_ref[...].astype(jnp.float32)          # (TB, K1, D)
    nh = nh_ref[...].astype(jnp.float32)          # (TB, K2, D)

    # pos: elementwise mul + lane-axis (D) reduction on the VPU/XLU.
    pos_ref[...] = jnp.sum(h_e * t_e, axis=-1, keepdims=True).astype(pos_ref.dtype)

    # neg: broadcast the single row over the K negatives, reduce over D (lanes).
    neg1 = jnp.sum(h_e[:, None, :] * nt, axis=-1)  # (TB, K1)
    neg2 = jnp.sum(nh * t_e[:, None, :], axis=-1)  # (TB, K2)
    neg_ref[...] = jnp.concatenate([neg1, neg2], axis=-1).astype(neg_ref.dtype)


def _score_kernel(h_ref, t_ref, n_ref, pos_ref, neg_ref):
    """Non-split branch (n_h is None). Blocks: h/t (TB, D); n (TB, K, D)."""
    h_e = h_ref[...].astype(jnp.float32)
    t_e = t_ref[...].astype(jnp.float32)
    n = n_ref[...].astype(jnp.float32)
    pos_ref[...] = jnp.sum(h_e * t_e, axis=-1, keepdims=True).astype(pos_ref.dtype)
    neg_ref[...] = jnp.sum(h_e[:, None, :] * n, axis=-1).astype(neg_ref.dtype)


def dot_decoder_forward(embed, h, t, n_s, drug_num, *, block_b=None):
    """embed: (V, D); h, t: (B, 1) int; n_s: (B, M) int.
    Returns (pos_score: (B, 1), neg_score: (B, M))."""
    B = h.shape[0]
    D = embed.shape[1]
    out_dtype = embed.dtype

    # Data-dependent branch from the PyTorch module, resolved host-side.
    # TODO(synk): this branch (torch.max(n_s < drug_num) == True) is decided
    # eagerly on the host; it cannot be traced inside the kernel.
    split_neg = bool(jnp.any(n_s < drug_num))

    # TODO(synk): scattered embedding-row gathers (embed[h], embed[t], embed[n_s])
    # are done with XLA's gather here rather than in-kernel DMA; per-row manual
    # DMAs would reintroduce the tiny-transfer-per-step overhead the review flags.
    h_e = jnp.take(embed, h.reshape(-1), axis=0)   # (B, D)
    t_e = jnp.take(embed, t.reshape(-1), axis=0)   # (B, D)

    # Batch-tile size: big enough to amortize per-grid-step overhead, sublane
    # aligned (multiple of 8). For very large B, cap so 2x-buffered blocks stay
    # well inside scoped VMEM on v5e/v7x.
    if block_b is None:
        block_b = min(256, _round_up(B, 8))
    block_b = max(8, block_b)
    Bp = _round_up(B, block_b)
    grid_b = Bp // block_b

    def pad_b(x):
        pad = Bp - B
        if pad == 0:
            return x
        return jnp.pad(x, ((0, pad),) + ((0, 0),) * (x.ndim - 1))

    h_e = pad_b(h_e)
    t_e = pad_b(t_e)

    compiler_params = pltpu.CompilerParams(dimension_semantics=("parallel",))

    if split_neg:
        # torch.chunk(n_s, 2, dim=1): first chunk gets the ceil on odd widths,
        # same as jnp.array_split.
        n_t, n_h = jnp.array_split(n_s, 2, axis=1)
        K1, K2 = n_t.shape[1], n_h.shape[1]
        nt_e = pad_b(jnp.take(embed, n_t, axis=0))  # (Bp, K1, D)
        nh_e = pad_b(jnp.take(embed, n_h, axis=0))  # (Bp, K2, D)

        pos, neg = pl.pallas_call(
            _score_split_kernel,
            out_shape=(
                jax.ShapeDtypeStruct((Bp, 1), out_dtype),
                jax.ShapeDtypeStruct((Bp, K1 + K2), out_dtype),
            ),
            grid_spec=pltpu.PrefetchScalarGridSpec(
                num_scalar_prefetch=0,
                grid=(grid_b,),
                in_specs=[
                    pl.BlockSpec((block_b, D), lambda b: (b, 0)),
                    pl.BlockSpec((block_b, D), lambda b: (b, 0)),
                    pl.BlockSpec((block_b, K1, D), lambda b: (b, 0, 0)),
                    pl.BlockSpec((block_b, K2, D), lambda b: (b, 0, 0)),
                ],
                out_specs=[
                    pl.BlockSpec((block_b, 1), lambda b: (b, 0)),
                    pl.BlockSpec((block_b, K1 + K2), lambda b: (b, 0)),
                ],
            ),
            compiler_params=compiler_params,
        )(h_e, t_e, nt_e, nh_e)
    else:
        K = n_s.shape[1]
        n_e = pad_b(jnp.take(embed, n_s, axis=0))   # (Bp, K, D)

        pos, neg = pl.pallas_call(
            _score_kernel,
            out_shape=(
                jax.ShapeDtypeStruct((Bp, 1), out_dtype),
                jax.ShapeDtypeStruct((Bp, K), out_dtype),
            ),
            grid_spec=pltpu.PrefetchScalarGridSpec(
                num_scalar_prefetch=0,
                grid=(grid_b,),
                in_specs=[
                    pl.BlockSpec((block_b, D), lambda b: (b, 0)),
                    pl.BlockSpec((block_b, D), lambda b: (b, 0)),
                    pl.BlockSpec((block_b, K, D), lambda b: (b, 0, 0)),
                ],
                out_specs=[
                    pl.BlockSpec((block_b, 1), lambda b: (b, 0)),
                    pl.BlockSpec((block_b, K), lambda b: (b, 0)),
                ],
            ),
            compiler_params=compiler_params,
        )(h_e, t_e, n_e)

    return pos[:B], neg[:B]


def dot_decoder_reference(embed, h, t, n_s, drug_num):
    """Plain-JAX mirror of DotDecoder.forward for verification."""
    split_neg = bool(jnp.any(n_s < drug_num))
    h_e = embed[h]                                   # (B, 1, D)
    t_e = embed[t]                                   # (B, 1, D)
    pos = jnp.sum(h_e * t_e, axis=-1)                # (B, 1)
    if split_neg:
        n_t, n_h = jnp.array_split(n_s, 2, axis=1)
        neg1 = jnp.sum(h_e * embed[n_t], axis=-1)    # (B, K1)
        neg2 = jnp.sum(embed[n_h] * t_e, axis=-1)    # (B, K2)
        neg = jnp.concatenate([neg1, neg2], axis=1)
    else:
        neg = jnp.sum(h_e * embed[n_s], axis=-1)
    return pos, neg


if __name__ == "__main__":
    # Small shapes: 64-row embedding table, 128-dim embeddings, 16 edges,
    # 4 negative tails + 4 negative heads per edge.
    V, D = 64, 128
    drug_num = 32
    B, K = 16, 4

    key = jax.random.PRNGKey(0)
    ke, kh, kt, kn = jax.random.split(key, 4)
    embed = jax.random.normal(ke, (V, D), dtype=jnp.float32)
    h = jax.random.randint(kh, (B, 1), 0, V, dtype=jnp.int32)
    t = jax.random.randint(kt, (B, 1), 0, V, dtype=jnp.int32)
    # All negatives < drug_num so the chunked (n_t, n_h) branch is exercised.
    n_s = jax.random.randint(kn, (B, 2 * K), 0, drug_num, dtype=jnp.int32)

    # block_b=8 -> grid=(2,): two batch tiles, both TensorCores busy on v7x.
    pos, neg = dot_decoder_forward(embed, h, t, n_s, drug_num, block_b=8)
    pos = jax.block_until_ready(pos)
    neg = jax.block_until_ready(neg)

    pos_ref, neg_ref = dot_decoder_reference(embed, h, t, n_s, drug_num)
    assert pos.shape == (B, 1) and neg.shape == (B, 2 * K)
    assert jnp.allclose(pos, pos_ref, atol=1e-5, rtol=1e-5)
    assert jnp.allclose(neg, neg_ref, atol=1e-5, rtol=1e-5)

    print("KERNEL_OK")
</pallas_src>

<mosaic_0001>
module attributes {stable_mosaic.version = 11 : i64} {
  func.func @_score_split_kernel(%arg0: i32, %arg1: memref<8x128xf32, #tpu.memory_space<vmem>>, %arg2: memref<8x128xf32, #tpu.memory_space<vmem>>, %arg3: memref<8x4x128xf32, #tpu.memory_space<vmem>>, %arg4: memref<8x4x128xf32, #tpu.memory_space<vmem>>, %arg5: memref<8x1xf32, #tpu.memory_space<vmem>>, %arg6: memref<8x8xf32, #tpu.memory_space<vmem>>) attributes {dimension_semantics = [#tpu.dimension_semantics<parallel>], iteration_bounds = array<i64: 2>, scalar_prefetch = 0 : i64, scratch_operands = 0 : i64, tpu.core_type = #tpu.core_type<tc>, window_params = [{transform_indices = @transform_0, window_bounds = array<i64: 8, 128>}, {transform_indices = @transform_1, window_bounds = array<i64: 8, 128>}, {transform_indices = @transform_2, window_bounds = array<i64: 8, 4, 128>}, {transform_indices = @transform_3, window_bounds = array<i64: 8, 4, 128>}, {transform_indices = @transform_4, window_bounds = array<i64: 8, 1>}, {transform_indices = @transform_5, window_bounds = array<i64: 8, 8>}]} {
    %c0 = arith.constant 0 : index
    %c0_0 = arith.constant 0 : index
    %0 = vector.load %arg1[%c0, %c0_0] : memref<8x128xf32, #tpu.memory_space<vmem>>, vector<8x128xf32>
    %c0_1 = arith.constant 0 : index
    %c0_2 = arith.constant 0 : index
    %1 = vector.load %arg2[%c0_1, %c0_2] : memref<8x128xf32, #tpu.memory_space<vmem>>, vector<8x128xf32>
    %c0_3 = arith.constant 0 : index
    %c0_4 = arith.constant 0 : index
    %c0_5 = arith.constant 0 : index
    %2 = vector.load %arg3[%c0_3, %c0_4, %c0_5] : memref<8x4x128xf32, #tpu.memory_space<vmem>>, vector<8x4x128xf32>
    %c0_6 = arith.constant 0 : index
    %c0_7 = arith.constant 0 : index
    %c0_8 = arith.constant 0 : index
    %3 = vector.load %arg4[%c0_6, %c0_7, %c0_8] : memref<8x4x128xf32, #tpu.memory_space<vmem>>, vector<8x4x128xf32>
    %4 = arith.mulf %0, %1 : vector<8x128xf32>
    %cst = arith.constant dense<0.000000e+00> : vector<8xf32>
    %5 = vector.multi_reduction <add>, %4, %cst [1] : vector<8x128xf32> to vector<8xf32>
    %6 = vector.shape_cast %5 : vector<8xf32> to vector<8x1xf32>
    %c0_9 = arith.constant 0 : index
    %c0_10 = arith.constant 0 : index
    %7 = vector.load %arg5[%c0_9, %c0_10] : memref<8x1xf32, #tpu.memory_space<vmem>>, vector<8x1xf32>
    tpu.vector_store %arg5[%c0_9, %c0_10], %6 {strides = array<i32>} : memref<8x1xf32, #tpu.memory_space<vmem>>, vector<8x1xf32>,
    %8 = vector.shape_cast %0 : vector<8x128xf32> to vector<8x1x128xf32>
    %9 = vector.broadcast %8 : vector<8x1x128xf32> to vector<8x4x128xf32>
    %10 = arith.mulf %9, %2 : vector<8x4x128xf32>
    %cst_11 = arith.constant dense<0.000000e+00> : vector<8x4xf32>
    %11 = vector.multi_reduction <add>, %10, %cst_11 [2] : vector<8x4x128xf32> to vector<8x4xf32>
    %12 = vector.shape_cast %1 : vector<8x128xf32> to vector<8x1x128xf32>
    %13 = vector.broadcast %12 : vector<8x1x128xf32> to vector<8x4x128xf32>
    %14 = arith.mulf %3, %13 : vector<8x4x128xf32>
    %cst_12 = arith.constant dense<0.000000e+00> : vector<8x4xf32>
    %15 = vector.multi_reduction <add>, %14, %cst_12 [2] : vector<8x4x128xf32> to vector<8x4xf32>
    %16 = tpu.concatenate %11, %15 in 1 : vector<8x4xf32>, vector<8x4xf32> -> vector<8x8xf32>
    %c0_13 = arith.constant 0 : index
    %c0_14 = arith.constant 0 : index
    %17 = vector.load %arg6[%c0_13, %c0_14] : memref<8x8xf32, #tpu.memory_space<vmem>>, vector<8x8xf32>
    tpu.vector_store %arg6[%c0_13, %c0_14], %16 {strides = array<i32>} : memref<8x8xf32, #tpu.memory_space<vmem>>, vector<8x8xf32>,
    return
  }
  func.func @transform_0(%arg0: i32) -> (i32, i32) {
    %c0_i32 = arith.constant 0 : i32
    %c0_i32_0 = arith.constant 0 : i32
    return %arg0, %c0_i32 : i32, i32
  }
  func.func @transform_1(%arg0: i32) -> (i32, i32) {
    %c0_i32 = arith.constant 0 : i32
    %c0_i32_0 = arith.constant 0 : i32
    return %arg0, %c0_i32 : i32, i32
  }
  func.func @transform_2(%arg0: i32) -> (i32, i32, i32) {
    %c0_i32 = arith.constant 0 : i32
    %c0_i32_0 = arith.constant 0 : i32
    %c0_i32_1 = arith.constant 0 : i32
    return %arg0, %c0_i32, %c0_i32_0 : i32, i32, i32
  }
  func.func @transform_3(%arg0: i32) -> (i32, i32, i32) {
    %c0_i32 = arith.constant 0 : i32
    %c0_i32_0 = arith.constant 0 : i32
    %c0_i32_1 = arith.constant 0 : i32
    return %arg0, %c0_i32, %c0_i32_0 : i32, i32, i32
  }
  func.func @transform_4(%arg0: i32) -> (i32, i32) {
    %c0_i32 = arith.constant 0 : i32
    %c0_i32_0 = arith.constant 0 : i32
    return %arg0, %c0_i32 : i32, i32
  }
  func.func @transform_5(%arg0: i32) -> (i32, i32) {
    %c0_i32 = arith.constant 0 : i32
    %c0_i32_0 = arith.constant 0 : i32
    return %arg0, %c0_i32 : i32, i32
  }
}

</mosaic_0001>

<bundles_post_ra>
// kernel: tpu_custom_call.1
= control target key start
LH: loop header
LB: loop body
LE: loop exit
PB: predicated region body
PF: predicated region fallthrough
CT: control target
= control target key end

     0   :  { %11 = vsyncpa [#allocation3], 0  ;;  %s1527_s0 = inlined_call_operand.hbm [shape: f32[16,128], index: 0, kind: input, shape index: {}]   ;;  %s1528_s1 = inlined_call_operand.hbm [shape: f32[16,128], index: 1, kind: input, shape index: {}]   ;;  %s1529_s2 = inlined_call_operand.hbm [shape: f32[16,4,128], index: 2, kind: input, shape index: {}]   ;;  %s1530_s3 = inlined_call_operand.hbm [shape: f32[16,4,128], index: 3, kind: input, shape index: {}]   ;;  %s1531_s4 = inlined_call_operand.vmem [shape: f32[16,1], index: 4, kind: output, shape index: {0}]   ;;  %s1532_s5 = inlined_call_operand.vmem [shape: f32[16,8], index: 5, kind: output, shape index: {1}]  }
   0x1   :  { %13 = vsyncpa [#allocation3 + $0x1], 0 }
   0x2   :  { %14 = vsyncpa [#allocation5], 0 }
   0x3   :  { %16 = vsyncpa [#allocation5 + $0x1], 0 }
   0x4   :  { %17 = vsyncpa [#allocation8], 0 }
   0x5   :  { %19 = vsyncpa [#allocation8 + $0x1], 0  ;;  %s1183_s18 = smov 0   ;;  %s1185_s19 = smov 0  }
   0x6   :  { %s1187_s20 = smov 0   ;;  %s1189_s21 = smov 0  }
   0x7 LB: > { %s1202_s22 = sadd.s32 4294967295, %s1144_s21   ;;  %s1205_s23 = sadd.s32 1, %s1144_s21   ;;  %s1144_s21 = sphi %s1189_s21, %s1546_s21   ;;  %s1140_s20 = sphi %s1187_s20, %s1545_s20   ;;  %s1136_s19 = sphi %s1185_s19, %s1544_s19   ;;  %s1132_s18 = sphi %s1183_s18, %s1543_s18  }
   0x8   : > { %s29_s24 = ssub.s32 %s1144_s21, %s1205_s23  ;;  %s32_s25 = sadd.s32 1, %s1140_s20 }
   0x9   : > { %p30_p0 = scmp.eq.s32.totalorder %s29_s24, 0  ;;  %p39_p1 = scmp.ne.s32.totalorder %s1140_s20, %s1136_s19 }
   0xa   : > { %p40_p2 = scmp.eq.s32.totalorder %s1144_s21, 0  ;;  %p45_p3 = scmp.ne.s32.totalorder %s1136_s19, %s1132_s18 }
   0xb   : > { %s1215_s26 = scalar_select %p30_p0, %s1140_s20, %s32_s25  }
   0xc   : > { %p41_p4 = por %p40_p2, %p39_p1  ;;  %p46_p5 = scmp.eq.s32.totalorder %s1202_s22, 0 }
   0xd   : > { %p952_p6 = scmp.lt.s32.totalorder %s1144_s21, 2  ;;  %s1224_s28 = sand.u32 1, %s1140_s20  }
   0xe   : > { %p1219_p7 = por %p46_p5, %p45_p3  ;;  %s910_s29 = sshll.u32 %s1224_s28, 3 }
   0xf   : > { %s911_s30 = sshll.u32 %s1144_s21, 7  ;;  %p1228_p8 = pnand %p952_p6, %p41_p4 }
  0x10   : > { %s1534_s27 = scalar_select %p1219_p7, 1, 0 }
  0x11   : > { %s217_s7 = sand.u32 1, %s1144_s21   ;;  %s1238_s10 = scalar_lea.hbm %s1528_s1, %s911_s30 }
  0x12   : > { %s221_s11 = scalar_lea.vmem [#allocation4], %s910_s29  ;;  %s1244_s14 = scalar_lea.sflag [#allocation5], %s217_s7 }
  0x13   : > { %s228_s12 = sshll.u32 %s221_s11, 4  ;;  %s990_s15 = scalar_lea.hbm %s1238_s10, 128  ;;  %s229_s12 = int_to_ptr.vmem [resolvable:$true] %s228_s12 }
  0x14   : > { %p991_p10 = scmp.ne.s32.totalorder %s1238_s10, %s990_s15  ;;  %p1250_p11 = pneg %p1228_p8 }
  0x15   : > { %s995_s24 = scalar_lea.hbm %s1528_s1, 256  ;;  %p996_p0 = scmp.lt.s32.totalorder %s1238_s10, %s1528_s1 }
  0x16   : > { %p993_p12 = pnand %p1250_p11, %p991_p10  ;;  %p997_p1 = scmp.lt.s32.totalorder %s995_s24, %s990_s15 }
  0x18   : > { %p994_p13 = pneg %p993_p12  ;;  %p998_p2 = por %p997_p1, %p996_p0 }
  0x1a   : > { %p999_p3 = pnand %p998_p2, %p994_p13 }
  0x1c   : > { %1002 = shalt.err (!%p999_p3)
}
  0x1d   : > { %s1003_s7 = scalar_lea.vmem %s229_s12, 128  ;;  %s1146_s9 = smov [#allocation4]  }
  0x1e   : > { %p1004_p4 = scmp.ne.s32.totalorder %s229_s12, %s1003_s7  ;;  %s1008_s11 = sshll.u32 %s1146_s9, 4  ;;  %s1009_s11 = int_to_ptr.vmem [resolvable:$false] %s1008_s11 }
  0x1f   : > { %s1010_s13 = scalar_lea.vmem %s1009_s11, 256  ;;  %p1011_p10 = scmp.lt.s32.totalorder %s229_s12, %s1009_s11 }
  0x20   : > { %p1006_p5 = pnand %p1004_p4, %p1250_p11  ;;  %p1012_p12 = scmp.lt.s32.totalorder %s1010_s13, %s1003_s7 }
  0x22   : > { %p1007_p6 = pneg %p1006_p5  ;;  %p1013_p9 = por %p1012_p12, %p1011_p10 }
  0x24   : > { %p1014_p7 = pnand %p1013_p9, %p1007_p6 }
  0x26   : > { %1017 = shalt.err (!%p1014_p7)
}
  0x27   : > { %945 = dma.hbm_to_vmem [thread:$0]  (!%p1228_p8), %s1238_s10, 128, %s229_s12, %s1244_s14  }
  0x28   : > { %p275_p13 = scmp.lt.s32.totalorder %s1144_s21, 3  ;;  %s1275_s13 = scalar_lea.hbm %s1527_s0, %s911_s30 }
  0x29   : > { %p1537_p9 = scmp.ge.s32.totalorder %s1144_s21, 1  ;;  %s203_s24 = scalar_lea.vmem [#allocation2], %s910_s29 }
  0x2a   : > { %s210_s25 = sshll.u32 %s203_s24, 4  ;;  %s200_s10 = scalar_lea.sflag [#allocation3], %s1224_s28  ;;  %s211_s25 = int_to_ptr.vmem [resolvable:$true] %s210_s25 }
  0x2b   : > { %p1279_p7 = pnand %p1537_p9, %p275_p13  ;;  %s1018_s12 = scalar_lea.hbm %s1275_s13, 128 }
  0x2c   : > { %p1019_p0 = scmp.ne.s32.totalorder %s1275_s13, %s1018_s12  ;;  %s1023_s7 = scalar_lea.hbm %s1527_s0, 256 }
  0x2d   : > { %s1538_s18 = scalar_select %p1279_p7, 1, 0 }
  0x2e   : > { %p1021_p1 = pnand %p1019_p0, %p1250_p11  ;;  %p1024_p3 = scmp.lt.s32.totalorder %s1275_s13, %s1527_s0 }
  0x2f   : > { %p1025_p4 = scmp.lt.s32.totalorder %s1023_s7, %s1018_s12 }
  0x30   : > { %p1022_p2 = pneg %p1021_p1 }
  0x31   : > { %p1026_p5 = por %p1025_p4, %p1024_p3 }
  0x33   : > { %p1027_p6 = pnand %p1026_p5, %p1022_p2 }
  0x35   : > { %1030 = shalt.err (!%p1027_p6)
}
  0x36   : > { %s1031_s29 = scalar_lea.vmem %s211_s25, 128  ;;  %s1147_s15 = smov [#allocation2]  }
  0x37   : > { %p1032_p10 = scmp.ne.s32.totalorder %s211_s25, %s1031_s29  ;;  %s1036_s17 = sshll.u32 %s1147_s15, 4  ;;  %s1037_s17 = int_to_ptr.vmem [resolvable:$false] %s1036_s17 }
  0x38   : > { %s1038_s24 = scalar_lea.vmem %s1037_s17, 256  ;;  %p1039_p9 = scmp.lt.s32.totalorder %s211_s25, %s1037_s17 }
  0x39   : > { %p1034_p12 = pnand %p1032_p10, %p1250_p11  ;;  %p1040_p0 = scmp.lt.s32.totalorder %s1038_s24, %s1031_s29 }
  0x3b   : > { %p1035_p13 = pneg %p1034_p12  ;;  %p1041_p1 = por %p1040_p0, %p1039_p9 }
  0x3d   : > { %p1042_p7 = pnand %p1041_p1, %p1035_p13 }
  0x3f   : > { %1045 = shalt.err (!%p1042_p7)
}
  0x40   : > { %942 = dma.hbm_to_vmem [thread:$0]  (!%p1228_p8), %s1275_s13, 128, %s211_s25, %s200_s10  }
  0x41   : > { %s929_s12 = sshll.u32 %s1144_s21, 9  ;;  %s1539_s30 = sshll.u32 %s1224_s28, 5 }
  0x42   : > { %s239_s8 = scalar_lea.vmem [#allocation6], %s1539_s30  ;;  %s1310_s29 = scalar_lea.hbm %s1529_s2, %s929_s12 }
  0x43   : > { %s246_s7 = sshll.u32 %s239_s8, 4  ;;  %s1046_s15 = scalar_lea.hbm %s1310_s29, 512  ;;  %s1312_s7 = int_to_ptr.vmem [resolvable:$true] %s246_s7 }
  0x44   : > { %p1047_p7 = scmp.ne.s32.totalorder %s1310_s29, %s1046_s15  ;;  %s1051_s10 = scalar_lea.hbm %s1529_s2, 1024 }
  0x45   : > { %p1052_p4 = scmp.lt.s32.totalorder %s1310_s29, %s1529_s2  ;;  %p1053_p5 = scmp.lt.s32.totalorder %s1051_s10, %s1046_s15 }
  0x46   : > { %p1049_p2 = pnand %p1047_p7, %p1250_p11 }
  0x47   : > { %p1054_p6 = por %p1053_p5, %p1052_p4 }
  0x48   : > { %p1050_p3 = pneg %p1049_p2 }
  0x4a   : > { %p1055_p10 = pnand %p1054_p6, %p1050_p3 }
  0x4c   : > { %1058 = shalt.err (!%p1055_p10)
}
  0x4d   : > { %s1059_s30 = scalar_lea.vmem %s1312_s7, 512  ;;  %s1148_s8 = smov [#allocation6]  }
  0x4e   : > { %p1060_p12 = scmp.ne.s32.totalorder %s1312_s7, %s1059_s30  ;;  %s1064_s9 = sshll.u32 %s1148_s8, 4  ;;  %s1065_s9 = int_to_ptr.vmem [resolvable:$false] %s1064_s9 }
  0x4f   : > { %s1066_s11 = scalar_lea.vmem %s1065_s9, 1024  ;;  %p1067_p0 = scmp.lt.s32.totalorder %s1312_s7, %s1065_s9 }
  0x50   : > { %p1062_p13 = pnand %p1060_p12, %p1250_p11  ;;  %p1068_p1 = scmp.lt.s32.totalorder %s1066_s11, %s1059_s30 }
  0x52   : > { %p1063_p9 = pneg %p1062_p13  ;;  %p1069_p7 = por %p1068_p1, %p1067_p0 }
  0x54   : > { %p1070_p2 = pnand %p1069_p7, %p1063_p9 }
  0x56   : > { %1073 = shalt.err (!%p1070_p2)
}
  0x57   : > { %s1149_s15 = smov 64   ;;  %s1150_s13 = smov 4  }
  0x58   : > { %948 = dma.hbm_to_vmem [thread:$0]  (!%p1228_p8), %s1310_s29, 512, %s1312_s7, %s1244_s14, %s1149_s15, %s1149_s15, %s1150_s13  }
  0x59   : > { %s1343_s17 = scalar_lea.hbm %s1530_s3, %s929_s12  ;;  %s1540_s24 = sshll.u32 %s1224_s28, 5 }
  0x5a   : > { %s260_s30 = scalar_lea.vmem [#allocation7], %s1540_s24  ;;  %s257_s9 = scalar_lea.sflag [#allocation8], %s1224_s28 }
  0x5b   : > { %s267_s8 = sshll.u32 %s260_s30, 4  ;;  %s1074_s11 = scalar_lea.hbm %s1343_s17, 512  ;;  %s1347_s8 = int_to_ptr.vmem [resolvable:$true] %s267_s8 }
  0x5c   : > { %p1075_p3 = scmp.ne.s32.totalorder %s1343_s17, %s1074_s11  ;;  %s1079_s7 = scalar_lea.hbm %s1530_s3, 1024 }
  0x5d   : > { %p1080_p6 = scmp.lt.s32.totalorder %s1343_s17, %s1530_s3  ;;  %p1081_p10 = scmp.lt.s32.totalorder %s1079_s7, %s1074_s11 }
  0x5e   : > { %p1077_p4 = pnand %p1075_p3, %p1250_p11 }
  0x5f   : > { %p1082_p12 = por %p1081_p10, %p1080_p6 }
  0x60   : > { %p1078_p5 = pneg %p1077_p4 }
  0x62   : > { %p1083_p13 = pnand %p1082_p12, %p1078_p5 }
  0x64   : > { %1086 = shalt.err (!%p1083_p13)
}
  0x65   : > { %s1087_s28 = scalar_lea.vmem %s1347_s8, 512  ;;  %s1151_s25 = smov [#allocation7]  }
  0x66   : > { %p1088_p9 = scmp.ne.s32.totalorder %s1347_s8, %s1087_s28  ;;  %s1092_s10 = sshll.u32 %s1151_s25, 4  ;;  %s1093_s10 = int_to_ptr.vmem [resolvable:$false] %s1092_s10 }
  0x67   : > { %s1094_s24 = scalar_lea.vmem %s1093_s10, 1024  ;;  %p1095_p7 = scmp.lt.s32.totalorder %s1347_s8, %s1093_s10 }
  0x68   : > { %p1090_p0 = pnand %p1088_p9, %p1250_p11  ;;  %p1096_p2 = scmp.lt.s32.totalorder %s1094_s24, %s1087_s28 }
  0x6a   : > { %p1091_p1 = pneg %p1090_p0  ;;  %p1097_p3 = por %p1096_p2, %p1095_p7 }
  0x6c   : > { %p1098_p4 = pnand %p1097_p3, %p1091_p1 }
  0x6e   : > { %1101 = shalt.err (!%p1098_p4)
}
  0x6f   : > { %951 = dma.hbm_to_vmem [thread:$0]  (!%p1228_p8), %s1343_s17, 512, %s1347_s8, %s257_s9, %s1149_s15, %s1149_s15, %s1150_s13  }
  0x70   : > { %p1541_p11 = scmp.ne.s32.totalorder %s1538_s18, 0 }
  0x71   : > { %s281_s16 = sand.u32 (!%p1541_p11), 1, %s1136_s19   ;;  %p1542_p5 = scmp.ne.s32.totalorder (!%p1541_p11), %s1534_s27, 0 }
  0x72   : > { %279 = sbr.rel (%p1541_p11) target bundleno = 314 (0x13a), region = 36  ;;  %s921_s30 = sshll.u32 (!%p1541_p11), %s281_s16, 3 }
  0x73   : > { %s282_s11 = scalar_lea.sflag (!%p1541_p11), [#allocation3], %s281_s16  ;;  %s285_s21 = scalar_lea.vmem (!%p1541_p11), [#allocation2], %s921_s30 }
  0x77   : > { %1119 = dma.done.wait (%p1542_p5), %s282_s11, 128  }
  0x78   : > { %1121 = vsyncadd (%p1542_p5), %s282_s11, 4294967168  ;;  %s290_s6 = sand.u32 1, %s1202_s22   ;;  %s294_s7 = scalar_lea.vmem [#allocation4], %s921_s30 }
  0x79   : > { %s291_s14 = scalar_lea.sflag [#allocation5], %s290_s6 }
  0x7a   : > { %1123 = dma.done.wait (%p1542_p5), %s291_s14, 640  }
  0x7b   : > { %1125 = vsyncadd (%p1542_p5), %s291_s14, 4294966656  ;;  %s923_s18 = sshll.u32 %s281_s16, 5  ;;  %s309_s13 = scalar_lea.sflag [#allocation8], %s281_s16 }
  0x7c   : > { %s1385_s15 = scalar_lea.vmem [#allocation6], %s923_s18  ;;  %s1387_s17 = scalar_lea.vmem [#allocation7], %s923_s18 }
  0x7d   : > { %1127 = dma.done.wait (%p1542_p5), %s309_s13, 512  }
  0x7e   : > { %1129 = vsyncadd (%p1542_p5), %s309_s13, 4294966784  ;;  %v395_v0 = vlaneseq  ;;  %v1152_v1 = vmov 1966171168   ;;  %v1404_v9 = vld [vmem:[%s294_s7] sm:$0xff]  ;;  %v1409_v11 = vld [vmem:[%s285_s21] sm:$0xff]  ;;  %vm488_vm0 = vcmask 1043456  }
  0x7f   : > { %v393_v2 = vunpack.c.l.s4 %v1152_v1  ;;  %v514_v14 = vcombine.high %v1404_v9, %v1404_v9  ;;  %v391_v15 = vcombine.high %v1409_v11, %v1409_v11  ;;  %v377_v20 = vld [vmem:[%s1387_s17] sm:$0xf]  ;;  %v378_v28 = vld [vmem:[%s1387_s17 + $0x4] sm:$0xf]  ;;  %v379_v38 = vld [vmem:[%s1387_s17 + $0x8] sm:$0xf] }
  0x80   : > { %v1393_v3 = vshrl.u32 %v395_v0, 7  ;;  %v1395_v4 = vand.u32 127, %v395_v0  ;;  %v369_v21 = vld [vmem:[%s1385_s15] sm:$0xf]  ;;  %v370_v29 = vld [vmem:[%s1385_s15 + $0x4] sm:$0xf] }
  0x81   : > { %v394_v5 = vunpack.c.0.s8 %v393_v2  ;;  %v371_v40 = vld [vmem:[%s1385_s15 + $0x8] sm:$0xf]  ;;  %v381_v48 = vld [vmem:[%s1387_s17 + $0x10] sm:$0xf]  ;;  %v380_v63 = vld [vmem:[%s1387_s17 + $0xc] sm:$0xf] }
  0x82   : > { %v700_v6 = vadd.s32 4294967292, %v1395_v4  ;;  %v1407_v10 = vsub.s32 0, %v1393_v3  ;;  %v373_v53 = vld [vmem:[%s1385_s15 + $0x10] sm:$0xf]  ;;  %p359_p8 = scmp.lt.s32.totalorder %s1202_s22, 1  ;;  %vm677_vm1 = vcmask 1041409  }
  0x83   : > { %v1399_v7 = vsub.s32 %v394_v5, %v1393_v3  ;;  %v372_v5 = vld [vmem:[%s1385_s15 + $0xc] sm:$0xf]  ;;  %vm679_vm2 = vcmask 1042434   ;;  %vm681_vm3 = vcmask 1043459   ;;  %vm683_vm4 = vcmask 1044484  }
  0x84   : > { %v1402_v8 = vsub.s32 %v700_v6, %v1393_v3  ;;  %s1548_s22 = smov (!%p359_p8, %s1202_s22), 1  ;;  %vm685_vm5 = vcmask 1045509   ;;  %vm687_vm6 = vcmask 1046534   ;;  %vm689_vm7 = vcmask 1047559  }
  0x85   : > { %v521_v12 = vrot.slane %v1404_v9, %v1399_v7  ;;  %v398_v13 = vrot.slane %v1409_v11, %v1399_v7  ;;  %v528_v22 = vrot.slane %v514_v14, %v1399_v7  ;;  %v405_v23 = vrot.slane %v391_v15, %v1399_v7  ;;  %s925_s27 = sshll.u32 %s1548_s22, 3 }
  0x86   : > { %vm741_vm8 = vcmask 31744   ;;  %s362_s22 = scalar_lea.vmem %s1531_s4, %s925_s27  ;;  %s366_s28 = scalar_lea.vmem %s1532_s5, %s925_s27  ;;  %vm388_vm9 = vcmask 7168   ;;  %vm743_vm10 = vcmask 64512  }
  0x87   : > { %v537_v16 = vrot.slane %v521_v12, %v1399_v7  ;;  %v414_v17 = vrot.slane %v398_v13, %v1399_v7  ;;  %v529_v18 = vcombine.high %v521_v12, %v521_v12  ;;  %v406_v19 = vcombine.high %v398_v13, %v398_v13 }
  0x88   : > { %v544_v32 = vrot.slane %v528_v22, %v1399_v7  ;;  %v421_v33 = vrot.slane %v405_v23, %v1399_v7  ;;  %v530_v57 = vcombine.high %v528_v22, %v528_v22  ;;  %v407_v58 = vcombine.high %v405_v23, %v405_v23 }
  0x89   : > { %v566_v24 = vrot.slane %v537_v16, %v1407_v10  ;;  %v443_v25 = vrot.slane %v414_v17, %v1407_v10  ;;  %v551_v26 = vrot.slane %v529_v18, %v1399_v7  ;;  %v428_v27 = vrot.slane %v406_v19, %v1399_v7  ;;  %v382_v19 = vld [vmem:[%s1387_s17 + $0x14] sm:$0xf] }
  0x8a   : > { %v559_v30 = vcombine.high %v537_v16, %v537_v16  ;;  %v436_v31 = vcombine.high %v414_v17, %v414_v17  ;;  %v582_v42 = vrot.slane %v544_v32, %v1407_v10  ;;  %v459_v49 = vrot.slane %v421_v33, %v1407_v10 }
  0x8b   : > { %v603_v34 = vmul.f32 %v566_v24, %v377_v20  ;;  %v480_v35 = vmul.f32 %v443_v25, %v369_v21  ;;  %v570_v36 = vrot.slane %v551_v26, %v1407_v10  ;;  %v447_v37 = vrot.slane %v428_v27, %v1407_v10  ;;  %v374_v20 = vld [vmem:[%s1385_s15 + $0x14] sm:$0xf] }
  0x8c   : > { %v574_v39 = vrot.slane %v559_v30, %v1407_v10  ;;  %v451_v41 = vrot.slane %v436_v31, %v1407_v10  ;;  %v561_v54 = vcombine.high %v551_v26, %v551_v26  ;;  %v438_v55 = vcombine.high %v428_v27, %v428_v27 }
  0x8d   : > { %v611_v43 = vsel %vm488_vm0, %v603_v34, 0.0  ;;  %v489_v44 = vsel %vm488_vm0, %v480_v35, 0.0  ;;  %v604_v45 = vmul.f32 %v570_v36, %v378_v28  ;;  %v481_v46 = vmul.f32 %v447_v37, %v370_v29  ;;  %v383_v28 = vld [vmem:[%s1387_s17 + $0x18] sm:$0xf]  ;;  %v384_v35 = vld [vmem:[%s1387_s17 + $0x1c] sm:$0xf] }
  0x8e   : > { %612 = vadd.xlane.f32.xlu1 %v611_v43  ;;  %490 = vadd.xlane.f32.xlu0 %v489_v44  ;;  %v605_v47 = vmul.f32 %v574_v39, %v379_v38  ;;  %v482_v52 = vmul.f32 %v451_v41, %v371_v40  ;;  %v607_v56 = vmul.f32 %v582_v42, %v381_v48  ;;  %v376_v36 = vld [vmem:[%s1385_s15 + $0x1c] sm:$0xf] }
  0x8f   : > { %v614_v50 = vsel %vm488_vm0, %v604_v45, 0.0  ;;  %v492_v51 = vsel %vm488_vm0, %v481_v46, 0.0  ;;  %v484_v60 = vmul.f32 %v459_v49, %v373_v53  ;;  %v578_v61 = vrot.slane %v561_v54, %v1407_v10 }
  0x90   : > { %v617_v59 = vsel %vm488_vm0, %v605_v47, 0.0  ;;  %v495_v62 = vsel %vm488_vm0, %v482_v52, 0.0  ;;  %v455_v0 = vrot.slane %v438_v55, %v1407_v10  ;;  %v558_v1 = vrot.slane %v530_v57, %v1399_v7 }
  0x91   : > { %v435_v2 = vrot.slane %v407_v58, %v1399_v7  ;;  %v623_v6 = vsel %vm488_vm0, %v607_v56, 0.0  ;;  %v501_v12 = vsel %vm488_vm0, %v484_v60, 0.0  ;;  %v606_v13 = vmul.f32 %v578_v61, %v380_v63 }
  0x92   : > { %615 = vadd.xlane.f32.xlu1 %v614_v50  ;;  %493 = vadd.xlane.f32.xlu0 %v492_v51  ;;  %v560_v14 = vcombine.high %v544_v32, %v544_v32  ;;  %v437_v15 = vcombine.high %v421_v33, %v421_v33  ;;  %v483_v16 = vmul.f32 %v455_v0, %v372_v5 }
  0x93   : > { %v586_v17 = vrot.slane %v558_v1, %v1407_v10  ;;  %v463_v18 = vrot.slane %v435_v2, %v1407_v10  ;;  %v1461_v7 = vsub.s32 %v1395_v4, %v1393_v3  ;;  %v620_v21 = vsel %vm488_vm0, %v606_v13, 0.0  ;;  %v375_v3 = vld [vmem:[%s1385_s15 + $0x18] sm:$0xf] }
  0x94   : > { %v590_v22 = vrot.slane %v560_v14, %v1407_v10  ;;  %v467_v23 = vrot.slane %v437_v15, %v1407_v10  ;;  %v562_v24 = vcombine.high %v558_v1, %v558_v1  ;;  %v498_v25 = vsel %vm488_vm0, %v483_v16, 0.0 }
  0x95   : > { %v608_v26 = vmul.f32 %v586_v17, %v382_v19  ;;  %v485_v27 = vmul.f32 %v463_v18, %v374_v20  ;;  %v439_v4 = vcombine.high %v435_v2, %v435_v2 }
  0x96   : > { %618 = vadd.xlane.f32.xlu1 %v617_v59  ;;  %496 = vadd.xlane.f32.xlu0 %v495_v62  ;;  %v609_v29 = vmul.f32 %v590_v22, %v383_v28  ;;  %v486_v30 = vmul.f32 %v467_v23, %v375_v3  ;;  %v594_v33 = vrot.slane %v562_v24, %v1407_v10 }
  0x97   : > { %v626_v31 = vsel %vm488_vm0, %v608_v26, 0.0  ;;  %v504_v32 = vsel %vm488_vm0, %v485_v27, 0.0  ;;  %v471_v34 = vrot.slane %v439_v4, %v1407_v10  ;;  %v385_v10 = vmul.f32 %v1404_v9, %v1409_v11 }
  0x98   : > { %v629_v37 = vsel %vm488_vm0, %v609_v29, 0.0  ;;  %v507_v38 = vsel %vm488_vm0, %v486_v30, 0.0  ;;  %v610_v39 = vmul.f32 %v594_v33, %v384_v35 }
  0x99   : > { %v487_v40 = vmul.f32 %v471_v34, %v376_v36 }
  0x9a   : > { %624 = vadd.xlane.f32.xlu1 %v623_v6  ;;  %502 = vadd.xlane.f32.xlu0 %v501_v12  ;;  %v632_v41 = vsel %vm488_vm0, %v610_v39, 0.0 }
  0x9b   : > { %v510_v42 = vsel %vm488_vm0, %v487_v40, 0.0 }
  0x9e   : > { %621 = vadd.xlane.f32.xlu1 %v620_v21  ;;  %499 = vadd.xlane.f32.xlu0 %v498_v25 }
  0xa2   : > { %627 = vadd.xlane.f32.xlu1 %v626_v31  ;;  %505 = vadd.xlane.f32.xlu0 %v504_v32 }
  0xa6   : > { %630 = vadd.xlane.f32.xlu1 %v629_v37  ;;  %508 = vadd.xlane.f32.xlu0 %v507_v38 }
  0xaa   : > { %633 = vadd.xlane.f32.xlu1 %v632_v41  ;;  %511 = vadd.xlane.f32.xlu0 %v510_v42 }
  0xae   : > { %386 = vadd.xlane.f32.xlu0 %v385_v10 }
 0x117   : > { %v613_v43 = vpop.xlane.xlu1 %612  ;;  %v491_v44 = vpop.xlane.xlu0 %490 }
 0x118   : > { %v704_v57 = vrot.slane %v613_v43, %v1402_v8  ;;  %v648_v58 = vrot.slane %v491_v44, %v1461_v7 }
 0x11b   : > { %v616_v45 = vpop.xlane.xlu1 %615  ;;  %v494_v46 = vpop.xlane.xlu0 %493 }
 0x11c   : > { %v708_v53 = vrot.slane %v616_v45, %v1402_v8  ;;  %v652_v54 = vrot.slane %v494_v46, %v1461_v7 }
 0x11e   : > { %v733_v61 = vsel %vm677_vm1, %v708_v53, %v704_v57  ;;  %v678_v62 = vsel %vm677_vm1, %v652_v54, %v648_v58 }
 0x11f   : > { %v619_v47 = vpop.xlane.xlu1 %618  ;;  %v497_v48 = vpop.xlane.xlu0 %496 }
 0x120   : > { %v712_v9 = vrot.slane %v619_v47, %v1402_v8  ;;  %v656_v11 = vrot.slane %v497_v48, %v1461_v7 }
 0x122   : > { %v734_v63 = vsel %vm679_vm2, %v712_v9, %v733_v61  ;;  %v680_v0 = vsel %vm679_vm2, %v656_v11, %v678_v62 }
 0x123   : > { %v625_v49 = vpop.xlane.xlu1 %624  ;;  %v503_v50 = vpop.xlane.xlu0 %502 }
 0x124   : > { %v720_v14 = vrot.slane %v625_v49, %v1402_v8  ;;  %v664_v15 = vrot.slane %v503_v50, %v1461_v7 }
 0x127   : > { %v622_v51 = vpop.xlane.xlu1 %621  ;;  %v500_v52 = vpop.xlane.xlu0 %499 }
 0x128   : > { %v716_v59 = vrot.slane %v622_v51, %v1402_v8  ;;  %v660_v60 = vrot.slane %v500_v52, %v1461_v7 }
 0x12a   : > { %v735_v5 = vsel %vm681_vm3, %v716_v59, %v734_v63  ;;  %v682_v6 = vsel %vm681_vm3, %v660_v60, %v680_v0 }
 0x12b   : > { %v628_v55 = vpop.xlane.xlu1 %627  ;;  %v506_v56 = vpop.xlane.xlu0 %505  ;;  %v736_v18 = vsel %vm683_vm4, %v720_v14, %v735_v5  ;;  %v684_v19 = vsel %vm683_vm4, %v664_v15, %v682_v6 }
 0x12c   : > { %v724_v12 = vrot.slane %v628_v55, %v1402_v8  ;;  %v668_v13 = vrot.slane %v506_v56, %v1461_v7 }
 0x12e   : > { %v737_v22 = vsel %vm685_vm5, %v724_v12, %v736_v18  ;;  %v686_v23 = vsel %vm685_vm5, %v668_v13, %v684_v19 }
 0x12f   : > { %v631_v1 = vpop.xlane.xlu1 %630  ;;  %v509_v2 = vpop.xlane.xlu0 %508 }
 0x130   : > { %v728_v16 = vrot.slane %v631_v1, %v1402_v8  ;;  %v672_v17 = vrot.slane %v509_v2, %v1461_v7 }
 0x132   : > { %v738_v26 = vsel %vm687_vm6, %v728_v16, %v737_v22  ;;  %v688_v27 = vsel %vm687_vm6, %v672_v17, %v686_v23 }
 0x133   : > { %v634_v20 = vpop.xlane.xlu1 %633  ;;  %v512_v21 = vpop.xlane.xlu0 %511 }
 0x134   : > { %v732_v24 = vrot.slane %v634_v20, %v1402_v8  ;;  %v676_v25 = vrot.slane %v512_v21, %v1461_v7 }
 0x136   : > { %v739_v28 = vsel %vm689_vm7, %v732_v24, %v738_v26  ;;  %v690_v3 = vsel %vm689_vm7, %v676_v25, %v688_v27 }
 0x137   : > { %v742_v4 = vsel %vm741_vm8, %v690_v3, %v739_v28  ;;  %v387_v29 = vpop.xlane.xlu0 %386 }
 0x138   : > { %744 = vst.msk [vmem:[%s366_s28] sm:$0xff] %vm743_vm10, %v742_v4 }
 0x139   : > { %389 = vst.msk [vmem:[%s362_s22] sm:$0xff] %vm388_vm9, %v387_v29 }
 0x13a PF: > { %p22_p6 = scmp.ge.s32.totalorder %s1205_s23, 4   ;;  %s1543_s18 = smov %s1136_s19 }
 0x13b   : > { %s1544_s19 = smov %s1140_s20  ;;  %s1545_s20 = smov %s1215_s26 }
 0x13c   : > { %s1546_s21 = smov %s1205_s23  ;;  %24 = sbr.rel (!%p22_p6) target bundleno = 7 (0x7), region = 125 }
 0x141   :  { %778 = vsyncpa [#allocation3], 1 }
 0x142   :  { %780 = vsyncpa [#allocation3 + $0x1], 1 }
 0x143   :  { %781 = vsyncpa [#allocation5], 1 }
 0x144   :  { %783 = vsyncpa [#allocation5 + $0x1], 1 }
 0x145   :  { %784 = vsyncpa [#allocation8], 1 }
 0x146   :  { %786 = vsyncpa [#allocation8 + $0x1], 1 }

</bundles_post_ra>
